<compile_context>
chip_gen: v6e
topology: v6e:2x2x1
jax: 0.10.0
libtpu: 0.0.40
codegen_flags: <defaults>
</compile_context>

<pallas_src>
import functools

import jax
import jax.numpy as jnp
from jax import lax
from jax.experimental import pallas as pl
from jax.experimental.pallas import tpu as pltpu


def _ce_kernel(pred_ref, label_ref, out_ref, acc_ref, *, total_rows, inv_n):
    pid = pl.program_id(0)
    last = pl.num_programs(0) - 1

    @pl.when(pid == 0)
    def _():
        acc_ref[...] = jnp.zeros_like(acc_ref)

    logits = pred_ref[...].astype(jnp.float32)            # (TN, C)
    tn, c = logits.shape
    labels = label_ref[...]                                # (TN, 1) int32

    # Numerically-stable cross entropy; reuse the shifted logits for both
    # reductions (saves a full-tile VPU subtract).
    m = jnp.max(logits, axis=-1, keepdims=True)            # (TN, 1)
    shifted = logits - m                                    # (TN, C)
    lse = jnp.log(jnp.sum(jnp.exp(shifted), axis=-1, keepdims=True))  # (TN, 1)

    col = lax.broadcasted_iota(jnp.int32, (tn, c), 1)       # (TN, C)
    tgt = jnp.sum(jnp.where(col == labels, shifted, 0.0),
                  axis=-1, keepdims=True)                   # (TN, 1)

    per_row = lse - tgt                                     # (TN, 1) NLL per sample

    if total_rows % tn != 0:
        # Last tile contains padding rows -> mask them out of the sum.
        row = lax.broadcasted_iota(jnp.int32, (tn, 1), 0) + pid * tn
        per_row = jnp.where(row < total_rows, per_row, 0.0)

    acc_ref[...] += jnp.sum(per_row, axis=0, keepdims=True)  # (1, 1)

    @pl.when(pid == last)
    def _():
        out_ref[...] = (acc_ref[...] * inv_n).astype(out_ref.dtype)


def _choose_block_rows(n, c, itemsize, target_bytes=2 * 1024 * 1024,
                       max_rows=1024):
    """Rows per tile: big enough to pipeline well, small enough for VMEM."""
    rows = target_bytes // max(1, c * itemsize)
    rows = max(8, min(max_rows, rows))
    rows = max(8, (rows // 8) * 8)            # sublane-aligned
    if n <= rows:
        return n                              # single full-extent block (always legal)
    return rows


def tus_criterion(pred, label, *, block_rows=None):
    """Mean cross-entropy loss, equivalent to TUsCriterion.forward.

    pred:  (N, C) float logits (f32 or bf16)
    label: (N,)   int class indices
    returns: scalar f32
    """
    n, c = pred.shape
    label2d = label.astype(jnp.int32).reshape(n, 1)

    if block_rows is None:
        block_rows = _choose_block_rows(n, c, pred.dtype.itemsize)

    grid = (pl.cdiv(n, block_rows),)
    kernel = functools.partial(_ce_kernel, total_rows=n, inv_n=1.0 / n)

    out = pl.pallas_call(
        kernel,
        out_shape=jax.ShapeDtypeStruct((1, 1), jnp.float32),
        grid_spec=pltpu.PrefetchScalarGridSpec(
            num_scalar_prefetch=0,
            grid=grid,
            in_specs=[
                pl.BlockSpec((block_rows, c), lambda i: (i, 0)),   # logits tile
                pl.BlockSpec((block_rows, 1), lambda i: (i, 0)),   # label tile
            ],
            out_specs=pl.BlockSpec((1, 1), lambda i: (0, 0)),
            scratch_shapes=[pltpu.VMEM((1, 1), jnp.float32)],
        ),
        compiler_params=pltpu.CompilerParams(
            # Row-tile axis is a reduction (accumulator resident) -> arbitrary.
            dimension_semantics=("arbitrary",)),
    )(pred, label2d)
    return out[0, 0]


if __name__ == "__main__":
    key = jax.random.PRNGKey(0)
    k1, k2 = jax.random.split(key)

    # Small shape consistent with the module (graph-classification logits).
    N, C = 8, 32
    pred = jax.random.normal(k1, (N, C), dtype=jnp.float32)
    label = jax.random.randint(k2, (N,), 0, C, dtype=jnp.int32)

    loss = jax.block_until_ready(tus_criterion(pred, label))

    ref = jnp.mean(jax.nn.logsumexp(pred, axis=-1) - pred[jnp.arange(N), label])
    assert jnp.allclose(loss, ref, atol=1e-5, rtol=1e-5), (loss, ref)

    # Also exercise the tiled path with a remainder block (N % TN != 0).
    N2, C2 = 300, 64
    k3, k4 = jax.random.split(k2)
    pred2 = jax.random.normal(k3, (N2, C2), dtype=jnp.float32)
    label2 = jax.random.randint(k4, (N2,), 0, C2, dtype=jnp.int32)
    loss2 = jax.block_until_ready(tus_criterion(pred2, label2, block_rows=128))
    ref2 = jnp.mean(jax.nn.logsumexp(pred2, axis=-1)
                    - pred2[jnp.arange(N2), label2])
    assert jnp.allclose(loss2, ref2, atol=1e-5, rtol=1e-5), (loss2, ref2)

    print("KERNEL_OK")
</pallas_src>

<mosaic_0001>
module attributes {stable_mosaic.version = 11 : i64} {
  func.func @_ce_kernel(%arg0: i32, %arg1: memref<8x32xf32, #tpu.memory_space<vmem>>, %arg2: memref<8x1xi32, #tpu.memory_space<vmem>>, %arg3: memref<1x1xf32, #tpu.memory_space<vmem>>, %arg4: memref<1x1xf32, #tpu.memory_space<vmem>>) attributes {dimension_semantics = [#tpu.dimension_semantics<arbitrary>], iteration_bounds = array<i64: 1>, scalar_prefetch = 0 : i64, scratch_operands = 1 : i64, tpu.core_type = #tpu.core_type<tc>, window_params = [{transform_indices = @transform_0, window_bounds = array<i64: 8, 32>}, {transform_indices = @transform_1, window_bounds = array<i64: 8, 1>}, {pipeline_mode = #tpu.pipeline_mode<synchronous>, transform_indices = @transform_2, window_bounds = array<i64: 1, 1>}]} {
    %c0_i32 = arith.constant 0 : i32
    %0 = arith.cmpi eq, %arg0, %c0_i32 : i32
    %1 = arith.extui %0 : i1 to i32
    %c0_i32_0 = arith.constant 0 : i32
    %2 = arith.cmpi ne, %1, %c0_i32_0 : i32
    scf.if %2 {
      %cst_14 = arith.constant 0.000000e+00 : f32
      %29 = vector.broadcast %cst_14 : f32 to vector<1x1xf32>
      %c0_15 = arith.constant 0 : index
      %c0_16 = arith.constant 0 : index
      %30 = vector.load %arg4[%c0_15, %c0_16] : memref<1x1xf32, #tpu.memory_space<vmem>>, vector<1x1xf32>
      tpu.vector_store %arg4[%c0_15, %c0_16], %29 {strides = array<i32>} : memref<1x1xf32, #tpu.memory_space<vmem>>, vector<1x1xf32>,
    } else {
    }
    %c0 = arith.constant 0 : index
    %c0_1 = arith.constant 0 : index
    %3 = vector.load %arg1[%c0, %c0_1] : memref<8x32xf32, #tpu.memory_space<vmem>>, vector<8x32xf32>
    %c0_2 = arith.constant 0 : index
    %c0_3 = arith.constant 0 : index
    %4 = vector.load %arg2[%c0_2, %c0_3] : memref<8x1xi32, #tpu.memory_space<vmem>>, vector<8x1xi32>
    %cst = arith.constant dense<0xFF800000> : vector<8xf32>
    %5 = vector.multi_reduction <maximumf>, %3, %cst [1] : vector<8x32xf32> to vector<8xf32>
    %6 = vector.shape_cast %5 : vector<8xf32> to vector<8x1xf32>
    %7 = vector.broadcast %6 : vector<8x1xf32> to vector<8x32xf32>
    %8 = arith.subf %3, %7 : vector<8x32xf32>
    %9 = math.exp %8 : vector<8x32xf32>
    %cst_4 = arith.constant dense<0.000000e+00> : vector<8xf32>
    %10 = vector.multi_reduction <add>, %9, %cst_4 [1] : vector<8x32xf32> to vector<8xf32>
    %11 = vector.shape_cast %10 : vector<8xf32> to vector<8x1xf32>
    %12 = math.log %11 : vector<8x1xf32>
    %13 = tpu.iota {dimensions = array<i32: 1>} : vector<8x32xi32>
    %14 = vector.broadcast %4 : vector<8x1xi32> to vector<8x32xi32>
    %15 = arith.cmpi eq, %13, %14 : vector<8x32xi32>
    %cst_5 = arith.constant 0.000000e+00 : f32
    %16 = vector.broadcast %cst_5 : f32 to vector<8x32xf32>
    %17 = arith.select %15, %8, %16 : vector<8x32xi1>, vector<8x32xf32>
    %cst_6 = arith.constant dense<0.000000e+00> : vector<8xf32>
    %18 = vector.multi_reduction <add>, %17, %cst_6 [1] : vector<8x32xf32> to vector<8xf32>
    %19 = vector.shape_cast %18 : vector<8xf32> to vector<8x1xf32>
    %20 = arith.subf %12, %19 : vector<8x1xf32>
    %c0_7 = arith.constant 0 : index
    %c0_8 = arith.constant 0 : index
    %21 = vector.load %arg4[%c0_7, %c0_8] : memref<1x1xf32, #tpu.memory_space<vmem>>, vector<1x1xf32>
    %cst_9 = arith.constant dense<0.000000e+00> : vector<1xf32>
    %22 = vector.multi_reduction <add>, %20, %cst_9 [0] : vector<8x1xf32> to vector<1xf32>
    %23 = vector.shape_cast %22 : vector<1xf32> to vector<1x1xf32>
    %24 = arith.addf %21, %23 : vector<1x1xf32>
    %c0_10 = arith.constant 0 : index
    %c0_11 = arith.constant 0 : index
    %25 = vector.load %arg4[%c0_10, %c0_11] : memref<1x1xf32, #tpu.memory_space<vmem>>, vector<1x1xf32>
    tpu.vector_store %arg4[%c0_10, %c0_11], %24 {strides = array<i32>} : memref<1x1xf32, #tpu.memory_space<vmem>>, vector<1x1xf32>,
    %c0_i32_12 = arith.constant 0 : i32
    %26 = arith.cmpi eq, %arg0, %c0_i32_12 : i32
    %27 = arith.extui %26 : i1 to i32
    %c0_i32_13 = arith.constant 0 : i32
    %28 = arith.cmpi ne, %27, %c0_i32_13 : i32
    scf.if %28 {
      %c0_14 = arith.constant 0 : index
      %c0_15 = arith.constant 0 : index
      %29 = vector.load %arg4[%c0_14, %c0_15] : memref<1x1xf32, #tpu.memory_space<vmem>>, vector<1x1xf32>
      %cst_16 = arith.constant 1.250000e-01 : f32
      %30 = vector.broadcast %cst_16 : f32 to vector<1x1xf32>
      %31 = arith.mulf %29, %30 : vector<1x1xf32>
      %c0_17 = arith.constant 0 : index
      %c0_18 = arith.constant 0 : index
      %32 = vector.load %arg3[%c0_17, %c0_18] : memref<1x1xf32, #tpu.memory_space<vmem>>, vector<1x1xf32>
      tpu.vector_store %arg3[%c0_17, %c0_18], %31 {strides = array<i32>} : memref<1x1xf32, #tpu.memory_space<vmem>>, vector<1x1xf32>,
    } else {
    }
    return
  }
  func.func @transform_0(%arg0: i32) -> (i32, i32) {
    %c0_i32 = arith.constant 0 : i32
    %c0_i32_0 = arith.constant 0 : i32
    return %arg0, %c0_i32 : i32, i32
  }
  func.func @transform_1(%arg0: i32) -> (i32, i32) {
    %c0_i32 = arith.constant 0 : i32
    %c0_i32_0 = arith.constant 0 : i32
    return %arg0, %c0_i32 : i32, i32
  }
  func.func @transform_2(%arg0: i32) -> (i32, i32) {
    %c0_i32 = arith.constant 0 : i32
    %c0_i32_0 = arith.constant 0 : i32
    %c0_i32_1 = arith.constant 0 : i32
    return %c0_i32, %c0_i32_0 : i32, i32
  }
}

</mosaic_0001>

<bundles_post_ra>
// kernel: tpu_custom_call.1
= control target key start
LH: loop header
LB: loop body
LE: loop exit
PB: predicated region body
PF: predicated region fallthrough
CT: control target
= control target key end

     0   :  { %vm20_vm0 = vcmask 261120   ;;  %s136_s0 = inlined_call_operand.vmem [shape: f32[8,32], index: 0, kind: input, shape index: {}]   ;;  %s137_s1 = inlined_call_operand.vmem [shape: s32[8,1], index: 1, kind: input, shape index: {}]   ;;  %s138_s2 = inlined_call_operand.hbm [shape: f32[1,1], index: 2, kind: output, shape index: {}]  }
   0x1   :  { %v18_v0 = vld [vmem:[%s136_s0] sm:$0xff] }
   0x2   :  { %7 = vsyncpa [#allocation4], 0  ;;  %v21_v1 = vsel %vm20_vm0, %v18_v0, -inf  ;;  %v103_v2 = vmov 0   ;;  %v19_v3 = vld [vmem:[%s137_s1] sm:$0xff]  ;;  %v32_v7 = vlaneseq  ;;  %vm16_vm2 = vcmask 0  }
   0x3   :  { %76 = vset.pattern.permute.xlu0 %v103_v2  ;;  %v104_v14 = vmov 0.0   ;;  %s105_s0 = smov [#allocation3]  }
   0x4   :  { %22 = vmax.xlane.f32.xlu0 %v21_v1  ;;  %v33_v8 = vand.u32 127, %v32_v7  ;;  %17 = vst.msk [vmem:[#allocation2] sm:$0x1] %vm16_vm2, %v104_v14  ;;  %s65_s1 = sshll.u32 %s105_s0, 4  ;;  %s66_s1 = int_to_ptr.vmem [resolvable:$true] %s65_s1 }
   0x5   :  { %s81_s13 = scalar_lea.vmem %s66_s1, 16  ;;  %s85_s14 = scalar_lea.vmem %s66_s1, 32 }
   0x6   :  { %p82_p0 = scmp.ne.s32.totalorder %s66_s1, %s81_s13  ;;  %p86_p1 = scmp.lt.s32.totalorder %s66_s1, %s66_s1 }
   0x7   :  { %p87_p2 = scmp.lt.s32.totalorder %s85_s14, %s81_s13 }
   0x9   :  { %p88_p3 = por %p87_p2, %p86_p1 }
   0xb   :  { %v43_v25 = vld [vmem:[#allocation2] sm:$0x1]  ;;  %p89_p4 = pnand %p88_p3, %p82_p0 }
  0x1a   :  { %35 = vperm.xlu0 %76, %v19_v3  }
  0x8d   :  { %v23_v4 = vpop.xlane.xlu0 %22 }
  0x8e   :  { %v24_v5 = vsub.f32 %v18_v0, %v23_v4 }
  0x90   :  { %v25_v6 = vmul.f32 1.442695, %v24_v5 }
  0x92   :  { %77 = vpow2.f32 %v25_v6 }
  0x95   :  { %v36_v9 = vpop.permute.xlu0 %35 }
  0x96   :  { %vm37_vm1 = vcmp.eq.s32.totalorder %v33_v8, %v36_v9 }
  0x97   :  { %v38_v12 = vsel %vm37_vm1, %v24_v5, 0.0 }
  0x98   :  { %v39_v13 = vsel %vm20_vm0, %v38_v12, 0.0 }
  0x9f   :  { %v78_v10 = vpop.eup %77 }
  0xa0   :  { %v27_v11 = vsel %vm20_vm0, %v78_v10, 0.0 }
  0xa1   :  { %28 = vadd.xlane.f32.xlu1 %v27_v11 }
  0xa5   :  { %40 = vadd.xlane.f32.xlu1 %v39_v13 }
 0x12a   :  { %v29_v15 = vpop.xlane.xlu1 %28 }
 0x12b   :  { %79 = vlog2.f32 %v29_v15 }
 0x12e   :  { %v41_v18 = vpop.xlane.xlu1 %40 }
 0x138   :  { %v80_v16 = vpop.eup %79 }
 0x139   :  { %v31_v17 = vmul.f32 0.6931472, %v80_v16 }
 0x13b   :  { %v42_v19 = vsub.f32 %v31_v17, %v41_v18 }
 0x13d   :  { %v44_v20 = vrot.slane %v42_v19, 4 }
 0x13f   :  { %v45_v21 = vadd.f32 %v44_v20, %v42_v19 }
 0x141   :  { %v46_v22 = vrot.slane %v45_v21, 2 }
 0x143   :  { %v47_v23 = vadd.f32 %v46_v22, %v45_v21 }
 0x145   :  { %v48_v24 = vrot.slane %v47_v23, 1 }
 0x147   :  { %v49_v26 = vadd.f32 %v48_v24, %v47_v23 }
 0x149   :  { %v50_v27 = vadd.f32 %v49_v26, %v43_v25 }
 0x14b   :  { %52 = vst.msk [vmem:[#allocation2] sm:$0x1] %vm16_vm2, %v50_v27 }
 0x152   :  { %v56_v28 = vld [vmem:[#allocation2] sm:$0x1] }
 0x153   :  { %v57_v29 = vmul.f32 0.125, %v56_v28 }
 0x155   :  { %58 = vst.msk [vmem:[#allocation3] sm:$0x1] %vm16_vm2, %v57_v29 }
 0x156   :  { %92 = shalt.err (!%p89_p4)
}
 0x157   :  { %68 = dma.vmem_to_hbm [thread:$0]  %s66_s1, 16, %s138_s2, [#allocation4]  }
 0x158   :  { %101 = dma.done.wait [#allocation4], 16  }
 0x159   :  { %102 = vsyncadd [#allocation4], 4294967280 }
 0x15a   :  { %72 = vsyncpa [#allocation4], 1 }

</bundles_post_ra>
